<compile_context>
chip_gen: v7x
topology: tpu7x:2x2x1
jax: 0.10.0
libtpu: 0.0.40
codegen_flags: <defaults>
</compile_context>

<pallas_src>
import functools

import jax
import jax.numpy as jnp
from jax.experimental import pallas as pl
from jax.experimental.pallas import tpu as pltpu


def _round_up(x, m):
    return (x + m - 1) // m * m


# ----------------------------- Pallas kernel ------------------------------- #
def _gata_fusion_kernel(x_ref, wf_ref, wgs_ref, b_ref, ksel_ref, wrk_ref,
                        wrl_ref, out_ref, *, hidden3):
    f32, bf16 = jnp.float32, jnp.bfloat16
    H3 = hidden3

    b = b_ref[...]                                    # [3, Op] f32

    # ---- fused filter stage: one [TB, in_pad] @ [in_pad, 3H] matmul ---------
    f = jnp.dot(x_ref[...], wf_ref[...], preferred_element_type=f32)
    f = jnp.maximum(f + b[0:1, :H3], 0.0)             # [TB, 3H] = [tf | cap | pre]
    f_bf = f.astype(bf16)

    # ---- fused gate stage: one [TB,3H]@[3H,3H] matmul + one sigmoid pass ----
    zg = jnp.dot(f_bf, wgs_ref[0], preferred_element_type=f32) + b[1:2, :H3]
    gates = pl.reciprocal(1.0 + jnp.exp(-zg), approx=True)
    # gating multiplicand [cap | cap | pre] via 0/1 selection matmul (reproduces
    # the PyTorch quirk tf_cnn_out = capsule_out * tf_cnn_gate exactly).
    mult = jnp.dot(f_bf, wgs_ref[1], preferred_element_type=f32)
    g_bf = (mult * gates).astype(bf16)                # [TB, 3H] gated outputs

    # ---- kron products via hoisted 0/1 selection matmuls --------------------
    # kron(a, b)[i, p*H + q] = a[i, p] * b[i, q]
    tf_r = jnp.dot(g_bf, ksel_ref[0], preferred_element_type=f32)   # [TB, H*H]
    cap_r = jnp.dot(g_bf, ksel_ref[1], preferred_element_type=f32)
    cap_t = jnp.dot(g_bf, ksel_ref[2], preferred_element_type=f32)
    pre_t = jnp.dot(g_bf, ksel_ref[3], preferred_element_type=f32)

    k_tc = (tf_r * cap_t).astype(bf16)
    k_tp = (tf_r * pre_t).astype(bf16)
    k_cp = (cap_r * pre_t).astype(bf16)

    # ---- representation layer: accumulating partial matmuls (no concat) -----
    acc = jnp.dot(g_bf, wrl_ref[...], preferred_element_type=f32)
    acc += jnp.dot(k_tc, wrk_ref[0], preferred_element_type=f32)
    acc += jnp.dot(k_tp, wrk_ref[1], preferred_element_type=f32)
    acc += jnp.dot(k_cp, wrk_ref[2], preferred_element_type=f32)

    out_ref[...] = jnp.maximum(acc + b[2:3, :], 0.0).astype(out_ref.dtype)


# --------------------------- host-side packing ----------------------------- #
def pack_params(params, *, hidden_size, out_size, sizes, in_pad):
    H = hidden_size
    H3, HH = 3 * H, H * H
    O = out_size
    Op = _round_up(O, 128)
    s_tf, s_cap, s_pre = sizes
    f32, bf16 = jnp.float32, jnp.bfloat16

    # block-diagonal filter weight [in_pad, 3H]
    wf = jnp.zeros((in_pad, H3), f32)
    wf = wf.at[0:s_tf, 0:H].set(params["w_tf"])
    wf = wf.at[s_tf:s_tf + s_cap, H:2 * H].set(params["w_cap"])
    wf = wf.at[s_tf + s_cap:s_tf + s_cap + s_pre, 2 * H:3 * H].set(params["w_pre"])

    # fused gate weight [3H, 3H]; zero blocks where a gate ignores an input
    wg = jnp.zeros((H3, H3), f32)
    wg = wg.at[H:2 * H, 0:H].set(params["wg_tf"][:H])         # cap -> g_tf
    wg = wg.at[2 * H:, 0:H].set(params["wg_tf"][H:])          # pre -> g_tf
    wg = wg.at[0:H, H:2 * H].set(params["wg_cap"][:H])        # tf  -> g_cap
    wg = wg.at[2 * H:, H:2 * H].set(params["wg_cap"][H:])     # pre -> g_cap
    wg = wg.at[0:H, 2 * H:].set(params["wg_pre"][:H])         # tf  -> g_pre
    wg = wg.at[H:2 * H, 2 * H:].set(params["wg_pre"][H:])     # cap -> g_pre

    # 0/1 selection so (filter_out @ sel) = [cap | cap | pre]
    src = jnp.concatenate([jnp.arange(H) + H, jnp.arange(H) + H,
                           jnp.arange(H) + 2 * H])
    sel = (jnp.arange(H3)[:, None] == src[None, :]).astype(f32)

    wgs = jnp.stack([wg, sel]).astype(bf16)                   # [2, 3H, 3H]

    # biases: row0 = filter biases, row1 = gate biases, row2 = rep bias
    b = jnp.zeros((3, Op), f32)
    b = (b.at[0, 0:H].set(params["b_tf"])
          .at[0, H:2 * H].set(params["b_cap"])
          .at[0, 2 * H:3 * H].set(params["b_pre"])
          .at[1, 0:H].set(params["bg_tf"])
          .at[1, H:2 * H].set(params["bg_cap"])
          .at[1, 2 * H:3 * H].set(params["bg_pre"])
          .at[2, 0:O].set(params["b_rep"]))

    # kron selection matrices [4, 3H, H*H] (repeat / tile as 0/1 matmuls)
    j = jnp.arange(HH)
    rows = jnp.arange(H3)[:, None]
    rep_idx, til_idx = j // H, j % H
    ksel = jnp.stack([
        (rows == rep_idx[None, :]),                 # tf_g  repeated (rows 0:H)
        (rows == (H + rep_idx)[None, :]),           # cap_g repeated
        (rows == (H + til_idx)[None, :]),           # cap_g tiled
        (rows == (2 * H + til_idx)[None, :]),       # pre_g tiled
    ]).astype(bf16)

    # representation weight split: linear block [3H, Op] + kron blocks [3, H*H, Op]
    w_rep = params["w_rep"]                                   # [3H + 3H^2, O]
    wrl = jnp.pad(w_rep[:H3], ((0, 0), (0, Op - O))).astype(bf16)
    wrk = jnp.pad(w_rep[H3:].reshape(3, HH, O),
                  ((0, 0), (0, 0), (0, Op - O))).astype(bf16)

    return dict(wf=wf.astype(bf16), wgs=wgs, b=b, ksel=ksel, wrk=wrk, wrl=wrl)


# ------------------------------ wrapper ------------------------------------ #
def gata_fusion_forward(x_tf, x_cap, x_pre, params, *, hidden_size, out_size,
                        block_b=256, out_dtype=jnp.float32):
    H = hidden_size
    H3, HH = 3 * H, H * H
    Op = _round_up(out_size, 128)
    sizes = (x_tf.shape[1], x_cap.shape[1], x_pre.shape[1])
    in_tot = sum(sizes)
    in_pad = _round_up(in_tot, 128)
    B = x_tf.shape[0]

    # Batch tile: multiple of 16 (bf16 sublane packing); when the batch is big
    # enough, keep >= 2 grid steps so v7x can shard them across both TensorCores.
    Bp16 = _round_up(B, 16)
    TB = min(_round_up(block_b, 16), Bp16)
    if Bp16 // TB < 2 and Bp16 >= 32:
        TB = _round_up(Bp16 // 2, 16)
    Bp = _round_up(B, TB)

    # single lane-dense bf16 input slab (one copy, not three)
    x = jnp.concatenate([x_tf, x_cap, x_pre], axis=1)
    x = jnp.pad(x, ((0, Bp - B), (0, in_pad - in_tot))).astype(jnp.bfloat16)

    pk = pack_params(params, hidden_size=H, out_size=out_size, sizes=sizes,
                     in_pad=in_pad)

    flops = 2 * Bp * (in_pad * H3 + 2 * H3 * H3 + 4 * H3 * HH
                      + 3 * HH * Op + H3 * Op)
    weight_bytes = 2 * (in_pad * H3 + 2 * H3 * H3 + 4 * H3 * HH
                        + 3 * HH * Op + H3 * Op) + 4 * 3 * Op
    bytes_accessed = (Bp * in_pad * 2
                      + Bp * Op * jnp.dtype(out_dtype).itemsize + weight_bytes)
    cost = pl.CostEstimate(flops=int(flops), transcendentals=int(Bp * H3),
                           bytes_accessed=int(bytes_accessed))

    kernel = functools.partial(_gata_fusion_kernel, hidden3=H3)
    out = pl.pallas_call(
        kernel,
        out_shape=jax.ShapeDtypeStruct((Bp, Op), out_dtype),
        grid=(Bp // TB,),
        in_specs=[
            pl.BlockSpec((TB, in_pad), lambda i: (i, 0)),       # packed inputs
            pl.BlockSpec((in_pad, H3), lambda i: (0, 0)),       # block-diag filter W
            pl.BlockSpec((2, H3, H3), lambda i: (0, 0, 0)),     # fused gate W + select
            pl.BlockSpec((3, Op), lambda i: (0, 0)),            # all biases
            pl.BlockSpec((4, H3, HH), lambda i: (0, 0, 0)),     # kron selection mats
            pl.BlockSpec((3, HH, Op), lambda i: (0, 0, 0)),     # rep W (kron blocks)
            pl.BlockSpec((H3, Op), lambda i: (0, 0)),           # rep W (linear block)
        ],
        out_specs=pl.BlockSpec((TB, Op), lambda i: (i, 0)),
        compiler_params=pltpu.CompilerParams(
            dimension_semantics=("parallel",)),
        cost_estimate=cost,
    )(x, pk["wf"], pk["wgs"], pk["b"], pk["ksel"], pk["wrk"], pk["wrl"])
    return out[:B, :out_size]


# --------------------- deterministic parameter init ------------------------ #
def init_params(key, tf_size, cap_size, pre_size, hidden_size, out_size):
    H, O = hidden_size, out_size

    def linear(k, d_in, d_out):
        kw, kb = jax.random.split(k)
        s = 1.0 / jnp.sqrt(jnp.float32(d_in))
        w = jax.random.uniform(kw, (d_in, d_out), jnp.float32, -s, s)
        b = jax.random.uniform(kb, (d_out,), jnp.float32, -s, s)
        return w, b

    ks = jax.random.split(key, 7)
    p = {}
    p["w_tf"], p["b_tf"] = linear(ks[0], tf_size, H)
    p["w_cap"], p["b_cap"] = linear(ks[1], cap_size, H)
    p["w_pre"], p["b_pre"] = linear(ks[2], pre_size, H)
    p["wg_tf"], p["bg_tf"] = linear(ks[3], 2 * H, H)
    p["wg_cap"], p["bg_cap"] = linear(ks[4], 2 * H, H)
    p["wg_pre"], p["bg_pre"] = linear(ks[5], 2 * H, H)
    p["w_rep"], p["b_rep"] = linear(ks[6], 3 * H + 3 * H * H, O)
    return p


# ------------------------- pure-JAX reference ------------------------------ #
def gata_fusion_reference(x_tf, x_cap, x_pre, params):
    relu = lambda z: jnp.maximum(z, 0.0)
    sig = lambda z: 1.0 / (1.0 + jnp.exp(-z))

    tf_out = relu(x_tf @ params["w_tf"] + params["b_tf"])
    cap_out = relu(x_cap @ params["w_cap"] + params["b_cap"])
    pre_out = relu(x_pre @ params["w_pre"] + params["b_pre"])

    g_tf = sig(jnp.concatenate([cap_out, pre_out], -1) @ params["wg_tf"] + params["bg_tf"])
    g_cap = sig(jnp.concatenate([tf_out, pre_out], -1) @ params["wg_cap"] + params["bg_cap"])
    g_pre = sig(jnp.concatenate([tf_out, cap_out], -1) @ params["wg_pre"] + params["bg_pre"])

    tf_out = cap_out * g_tf     # matches the PyTorch reference exactly
    cap_out = cap_out * g_cap
    pre_out = pre_out * g_pre

    def kron(a, b):
        return (a[:, :, None] * b[:, None, :]).reshape(a.shape[0], -1)

    data = jnp.concatenate(
        [tf_out, cap_out, pre_out,
         kron(tf_out, cap_out), kron(tf_out, pre_out), kron(cap_out, pre_out)], -1)
    return relu(data @ params["w_rep"] + params["b_rep"])


# --------------------------------- main ------------------------------------ #
if __name__ == "__main__":
    B = 8
    tf_cnn_size, dense_capsule_size, pretrain_size = 24, 40, 56
    hidden_size, out_size = 16, 32

    key = jax.random.PRNGKey(0)
    k_p, k_tf, k_cap, k_pre = jax.random.split(key, 4)

    params = init_params(k_p, tf_cnn_size, dense_capsule_size, pretrain_size,
                         hidden_size, out_size)
    x_tf = jax.random.normal(k_tf, (B, tf_cnn_size), jnp.float32)
    x_cap = jax.random.normal(k_cap, (B, dense_capsule_size), jnp.float32)
    x_pre = jax.random.normal(k_pre, (B, pretrain_size), jnp.float32)

    out = gata_fusion_forward(x_tf, x_cap, x_pre, params,
                              hidden_size=hidden_size, out_size=out_size)
    out = jax.block_until_ready(out)

    ref = gata_fusion_reference(x_tf, x_cap, x_pre, params)
    assert out.shape == (B, out_size)
    max_err = float(jnp.max(jnp.abs(out - ref)))
    assert jnp.allclose(out, ref, atol=2e-2, rtol=2e-2), (
        f"mismatch vs JAX reference, max abs err = {max_err}")

    print("KERNEL_OK")
</pallas_src>

<mosaic_0001>
module attributes {stable_mosaic.version = 11 : i64} {
  func.func @_gata_fusion_kernel(%arg0: i32, %arg1: memref<16x128xbf16, #tpu.memory_space<vmem>>, %arg2: memref<128x48xbf16, #tpu.memory_space<vmem>>, %arg3: memref<2x48x48xbf16, #tpu.memory_space<vmem>>, %arg4: memref<3x128xf32, #tpu.memory_space<vmem>>, %arg5: memref<4x48x256xbf16, #tpu.memory_space<vmem>>, %arg6: memref<3x256x128xbf16, #tpu.memory_space<vmem>>, %arg7: memref<48x128xbf16, #tpu.memory_space<vmem>>, %arg8: memref<16x128xf32, #tpu.memory_space<vmem>>) attributes {dimension_semantics = [#tpu.dimension_semantics<parallel>], iteration_bounds = array<i64: 1>, scalar_prefetch = 0 : i64, scratch_operands = 0 : i64, tpu.core_type = #tpu.core_type<tc>, window_params = [{transform_indices = @transform_0, window_bounds = array<i64: 16, 128>}, {pipeline_mode = #tpu.pipeline_mode<synchronous>, transform_indices = @transform_1, window_bounds = array<i64: 128, 48>}, {pipeline_mode = #tpu.pipeline_mode<synchronous>, transform_indices = @transform_2, window_bounds = array<i64: 2, 48, 48>}, {pipeline_mode = #tpu.pipeline_mode<synchronous>, transform_indices = @transform_3, window_bounds = array<i64: 3, 128>}, {pipeline_mode = #tpu.pipeline_mode<synchronous>, transform_indices = @transform_4, window_bounds = array<i64: 4, 48, 256>}, {pipeline_mode = #tpu.pipeline_mode<synchronous>, transform_indices = @transform_5, window_bounds = array<i64: 3, 256, 128>}, {pipeline_mode = #tpu.pipeline_mode<synchronous>, transform_indices = @transform_6, window_bounds = array<i64: 48, 128>}, {transform_indices = @transform_7, window_bounds = array<i64: 16, 128>}]} {
    %c0 = arith.constant 0 : index
    %c0_0 = arith.constant 0 : index
    %0 = vector.load %arg4[%c0, %c0_0] : memref<3x128xf32, #tpu.memory_space<vmem>>, vector<3x128xf32>
    %c0_1 = arith.constant 0 : index
    %c0_2 = arith.constant 0 : index
    %1 = vector.load %arg1[%c0_1, %c0_2] : memref<16x128xbf16, #tpu.memory_space<vmem>>, vector<16x128xbf16>
    %c0_3 = arith.constant 0 : index
    %c0_4 = arith.constant 0 : index
    %2 = vector.load %arg2[%c0_3, %c0_4] : memref<128x48xbf16, #tpu.memory_space<vmem>>, vector<128x48xbf16>
    %cst = arith.constant dense<0.000000e+00> : vector<16x48xf32>
    %3 = tpu.matmul %1, %2, %cst {dimension_numbers = #tpu.dot_dimension_numbers<[1], [0], [0], [1], [0, 0, 1, 1], [], []>} : vector<16x128xbf16>, vector<128x48xbf16>, vector<16x48xf32> -> vector<16x48xf32>
    %4 = vector.extract_strided_slice %0 {offsets = [0, 0], sizes = [1, 48], strides = [1, 1]} : vector<3x128xf32> to vector<1x48xf32>
    %5 = vector.broadcast %4 : vector<1x48xf32> to vector<16x48xf32>
    %6 = arith.addf %3, %5 : vector<16x48xf32>
    %cst_5 = arith.constant 0.000000e+00 : f32
    %7 = vector.broadcast %cst_5 : f32 to vector<16x48xf32>
    %8 = arith.maximumf %6, %7 : vector<16x48xf32>
    %9 = arith.truncf %8 : vector<16x48xf32> to vector<16x48xbf16>
    %c0_6 = arith.constant 0 : index
    %c0_7 = arith.constant 0 : index
    %c0_8 = arith.constant 0 : index
    %10 = vector.load %arg3[%c0_6, %c0_7, %c0_8] : memref<2x48x48xbf16, #tpu.memory_space<vmem>>, vector<1x48x48xbf16>
    %11 = vector.shape_cast %10 : vector<1x48x48xbf16> to vector<48x48xbf16>
    %cst_9 = arith.constant dense<0.000000e+00> : vector<16x48xf32>
    %12 = tpu.matmul %9, %11, %cst_9 {dimension_numbers = #tpu.dot_dimension_numbers<[1], [0], [0], [1], [0, 0, 1, 1], [], []>} : vector<16x48xbf16>, vector<48x48xbf16>, vector<16x48xf32> -> vector<16x48xf32>
    %13 = vector.extract_strided_slice %0 {offsets = [1, 0], sizes = [1, 48], strides = [1, 1]} : vector<3x128xf32> to vector<1x48xf32>
    %14 = vector.broadcast %13 : vector<1x48xf32> to vector<16x48xf32>
    %15 = arith.addf %12, %14 : vector<16x48xf32>
    %cst_10 = arith.constant 0.000000e+00 : f32
    %16 = vector.broadcast %cst_10 : f32 to vector<16x48xf32>
    %17 = arith.subf %16, %15 : vector<16x48xf32>
    %18 = math.exp %17 : vector<16x48xf32>
    %cst_11 = arith.constant 1.000000e+00 : f32
    %19 = vector.broadcast %cst_11 : f32 to vector<16x48xf32>
    %20 = arith.addf %19, %18 : vector<16x48xf32>
    %21 = tpu.reciprocal %20 {approx = true} : vector<16x48xf32> -> vector<16x48xf32>
    %c1 = arith.constant 1 : index
    %c0_12 = arith.constant 0 : index
    %c0_13 = arith.constant 0 : index
    %22 = vector.load %arg3[%c1, %c0_12, %c0_13] : memref<2x48x48xbf16, #tpu.memory_space<vmem>>, vector<1x48x48xbf16>
    %23 = vector.shape_cast %22 : vector<1x48x48xbf16> to vector<48x48xbf16>
    %cst_14 = arith.constant dense<0.000000e+00> : vector<16x48xf32>
    %24 = tpu.matmul %9, %23, %cst_14 {dimension_numbers = #tpu.dot_dimension_numbers<[1], [0], [0], [1], [0, 0, 1, 1], [], []>} : vector<16x48xbf16>, vector<48x48xbf16>, vector<16x48xf32> -> vector<16x48xf32>
    %25 = arith.mulf %24, %21 : vector<16x48xf32>
    %26 = arith.truncf %25 : vector<16x48xf32> to vector<16x48xbf16>
    %c0_15 = arith.constant 0 : index
    %c0_16 = arith.constant 0 : index
    %c0_17 = arith.constant 0 : index
    %27 = vector.load %arg5[%c0_15, %c0_16, %c0_17] : memref<4x48x256xbf16, #tpu.memory_space<vmem>>, vector<1x48x256xbf16>
    %28 = vector.shape_cast %27 : vector<1x48x256xbf16> to vector<48x256xbf16>
    %cst_18 = arith.constant dense<0.000000e+00> : vector<16x256xf32>
    %29 = tpu.matmul %26, %28, %cst_18 {dimension_numbers = #tpu.dot_dimension_numbers<[1], [0], [0], [1], [0, 0, 1, 1], [], []>} : vector<16x48xbf16>, vector<48x256xbf16>, vector<16x256xf32> -> vector<16x256xf32>
    %c1_19 = arith.constant 1 : index
    %c0_20 = arith.constant 0 : index
    %c0_21 = arith.constant 0 : index
    %30 = vector.load %arg5[%c1_19, %c0_20, %c0_21] : memref<4x48x256xbf16, #tpu.memory_space<vmem>>, vector<1x48x256xbf16>
    %31 = vector.shape_cast %30 : vector<1x48x256xbf16> to vector<48x256xbf16>
    %cst_22 = arith.constant dense<0.000000e+00> : vector<16x256xf32>
    %32 = tpu.matmul %26, %31, %cst_22 {dimension_numbers = #tpu.dot_dimension_numbers<[1], [0], [0], [1], [0, 0, 1, 1], [], []>} : vector<16x48xbf16>, vector<48x256xbf16>, vector<16x256xf32> -> vector<16x256xf32>
    %c2 = arith.constant 2 : index
    %c0_23 = arith.constant 0 : index
    %c0_24 = arith.constant 0 : index
    %33 = vector.load %arg5[%c2, %c0_23, %c0_24] : memref<4x48x256xbf16, #tpu.memory_space<vmem>>, vector<1x48x256xbf16>
    %34 = vector.shape_cast %33 : vector<1x48x256xbf16> to vector<48x256xbf16>
    %cst_25 = arith.constant dense<0.000000e+00> : vector<16x256xf32>
    %35 = tpu.matmul %26, %34, %cst_25 {dimension_numbers = #tpu.dot_dimension_numbers<[1], [0], [0], [1], [0, 0, 1, 1], [], []>} : vector<16x48xbf16>, vector<48x256xbf16>, vector<16x256xf32> -> vector<16x256xf32>
    %c3 = arith.constant 3 : index
    %c0_26 = arith.constant 0 : index
    %c0_27 = arith.constant 0 : index
    %36 = vector.load %arg5[%c3, %c0_26, %c0_27] : memref<4x48x256xbf16, #tpu.memory_space<vmem>>, vector<1x48x256xbf16>
    %37 = vector.shape_cast %36 : vector<1x48x256xbf16> to vector<48x256xbf16>
    %cst_28 = arith.constant dense<0.000000e+00> : vector<16x256xf32>
    %38 = tpu.matmul %26, %37, %cst_28 {dimension_numbers = #tpu.dot_dimension_numbers<[1], [0], [0], [1], [0, 0, 1, 1], [], []>} : vector<16x48xbf16>, vector<48x256xbf16>, vector<16x256xf32> -> vector<16x256xf32>
    %39 = arith.mulf %29, %35 : vector<16x256xf32>
    %40 = arith.truncf %39 : vector<16x256xf32> to vector<16x256xbf16>
    %41 = arith.mulf %29, %38 : vector<16x256xf32>
    %42 = arith.truncf %41 : vector<16x256xf32> to vector<16x256xbf16>
    %43 = arith.mulf %32, %38 : vector<16x256xf32>
    %44 = arith.truncf %43 : vector<16x256xf32> to vector<16x256xbf16>
    %c0_29 = arith.constant 0 : index
    %c0_30 = arith.constant 0 : index
    %45 = vector.load %arg7[%c0_29, %c0_30] : memref<48x128xbf16, #tpu.memory_space<vmem>>, vector<48x128xbf16>
    %cst_31 = arith.constant dense<0.000000e+00> : vector<16x128xf32>
    %46 = tpu.matmul %26, %45, %cst_31 {dimension_numbers = #tpu.dot_dimension_numbers<[1], [0], [0], [1], [0, 0, 1, 1], [], []>} : vector<16x48xbf16>, vector<48x128xbf16>, vector<16x128xf32> -> vector<16x128xf32>
    %c0_32 = arith.constant 0 : index
    %c0_33 = arith.constant 0 : index
    %c0_34 = arith.constant 0 : index
    %47 = vector.load %arg6[%c0_32, %c0_33, %c0_34] : memref<3x256x128xbf16, #tpu.memory_space<vmem>>, vector<1x256x128xbf16>
    %48 = vector.shape_cast %47 : vector<1x256x128xbf16> to vector<256x128xbf16>
    %cst_35 = arith.constant dense<0.000000e+00> : vector<16x128xf32>
    %49 = tpu.matmul %40, %48, %cst_35 {dimension_numbers = #tpu.dot_dimension_numbers<[1], [0], [0], [1], [0, 0, 1, 1], [], []>} : vector<16x256xbf16>, vector<256x128xbf16>, vector<16x128xf32> -> vector<16x128xf32>
    %50 = arith.addf %46, %49 : vector<16x128xf32>
    %c1_36 = arith.constant 1 : index
    %c0_37 = arith.constant 0 : index
    %c0_38 = arith.constant 0 : index
    %51 = vector.load %arg6[%c1_36, %c0_37, %c0_38] : memref<3x256x128xbf16, #tpu.memory_space<vmem>>, vector<1x256x128xbf16>
    %52 = vector.shape_cast %51 : vector<1x256x128xbf16> to vector<256x128xbf16>
    %cst_39 = arith.constant dense<0.000000e+00> : vector<16x128xf32>
    %53 = tpu.matmul %42, %52, %cst_39 {dimension_numbers = #tpu.dot_dimension_numbers<[1], [0], [0], [1], [0, 0, 1, 1], [], []>} : vector<16x256xbf16>, vector<256x128xbf16>, vector<16x128xf32> -> vector<16x128xf32>
    %54 = arith.addf %50, %53 : vector<16x128xf32>
    %c2_40 = arith.constant 2 : index
    %c0_41 = arith.constant 0 : index
    %c0_42 = arith.constant 0 : index
    %55 = vector.load %arg6[%c2_40, %c0_41, %c0_42] : memref<3x256x128xbf16, #tpu.memory_space<vmem>>, vector<1x256x128xbf16>
    %56 = vector.shape_cast %55 : vector<1x256x128xbf16> to vector<256x128xbf16>
    %cst_43 = arith.constant dense<0.000000e+00> : vector<16x128xf32>
    %57 = tpu.matmul %44, %56, %cst_43 {dimension_numbers = #tpu.dot_dimension_numbers<[1], [0], [0], [1], [0, 0, 1, 1], [], []>} : vector<16x256xbf16>, vector<256x128xbf16>, vector<16x128xf32> -> vector<16x128xf32>
    %58 = arith.addf %54, %57 : vector<16x128xf32>
    %59 = vector.extract_strided_slice %0 {offsets = [2, 0], sizes = [1, 128], strides = [1, 1]} : vector<3x128xf32> to vector<1x128xf32>
    %60 = vector.broadcast %59 : vector<1x128xf32> to vector<16x128xf32>
    %61 = arith.addf %58, %60 : vector<16x128xf32>
    %cst_44 = arith.constant 0.000000e+00 : f32
    %62 = vector.broadcast %cst_44 : f32 to vector<16x128xf32>
    %63 = arith.maximumf %61, %62 : vector<16x128xf32>
    %c0_45 = arith.constant 0 : index
    %c0_46 = arith.constant 0 : index
    %64 = vector.load %arg8[%c0_45, %c0_46] : memref<16x128xf32, #tpu.memory_space<vmem>>, vector<16x128xf32>
    tpu.vector_store %arg8[%c0_45, %c0_46], %63 {strides = array<i32>} : memref<16x128xf32, #tpu.memory_space<vmem>>, vector<16x128xf32>,
    return
  }
  func.func @transform_0(%arg0: i32) -> (i32, i32) {
    %c0_i32 = arith.constant 0 : i32
    %c0_i32_0 = arith.constant 0 : i32
    return %arg0, %c0_i32 : i32, i32
  }
  func.func @transform_1(%arg0: i32) -> (i32, i32) {
    %c0_i32 = arith.constant 0 : i32
    %c0_i32_0 = arith.constant 0 : i32
    %c0_i32_1 = arith.constant 0 : i32
    return %c0_i32, %c0_i32_0 : i32, i32
  }
  func.func @transform_2(%arg0: i32) -> (i32, i32, i32) {
    %c0_i32 = arith.constant 0 : i32
    %c0_i32_0 = arith.constant 0 : i32
    %c0_i32_1 = arith.constant 0 : i32
    %c0_i32_2 = arith.constant 0 : i32
    return %c0_i32, %c0_i32_0, %c0_i32_1 : i32, i32, i32
  }
  func.func @transform_3(%arg0: i32) -> (i32, i32) {
    %c0_i32 = arith.constant 0 : i32
    %c0_i32_0 = arith.constant 0 : i32
    %c0_i32_1 = arith.constant 0 : i32
    return %c0_i32, %c0_i32_0 : i32, i32
  }
  func.func @transform_4(%arg0: i32) -> (i32, i32, i32) {
    %c0_i32 = arith.constant 0 : i32
    %c0_i32_0 = arith.constant 0 : i32
    %c0_i32_1 = arith.constant 0 : i32
    %c0_i32_2 = arith.constant 0 : i32
    return %c0_i32, %c0_i32_0, %c0_i32_1 : i32, i32, i32
  }
  func.func @transform_5(%arg0: i32) -> (i32, i32, i32) {
    %c0_i32 = arith.constant 0 : i32
    %c0_i32_0 = arith.constant 0 : i32
    %c0_i32_1 = arith.constant 0 : i32
    %c0_i32_2 = arith.constant 0 : i32
    return %c0_i32, %c0_i32_0, %c0_i32_1 : i32, i32, i32
  }
  func.func @transform_6(%arg0: i32) -> (i32, i32) {
    %c0_i32 = arith.constant 0 : i32
    %c0_i32_0 = arith.constant 0 : i32
    %c0_i32_1 = arith.constant 0 : i32
    return %c0_i32, %c0_i32_0 : i32, i32
  }
  func.func @transform_7(%arg0: i32) -> (i32, i32) {
    %c0_i32 = arith.constant 0 : i32
    %c0_i32_0 = arith.constant 0 : i32
    return %arg0, %c0_i32 : i32, i32
  }
}

</mosaic_0001>

<bundles_post_ra>
// kernel: tpu_custom_call.1
= control target key start
LH: loop header
LB: loop body
LE: loop exit
PB: predicated region body
PF: predicated region fallthrough
CT: control target
= control target key end

     0   :  { %12 = vsyncpa [#allocation3], 0  ;;  %s1898_s0 = inlined_call_operand.vmem [shape: bf16[16,128], index: 0, kind: input, shape index: {}]   ;;  %s1899_s1 = inlined_call_operand.vmem [shape: bf16[128,48], index: 1, kind: input, shape index: {}]   ;;  %s1900_s2 = inlined_call_operand.vmem [shape: bf16[2,48,48], index: 2, kind: input, shape index: {}]   ;;  %s1901_s3 = inlined_call_operand.vmem [shape: f32[3,128], index: 3, kind: input, shape index: {}]   ;;  %s1902_s4 = inlined_call_operand.hbm [shape: bf16[4,48,256], index: 4, kind: input, shape index: {}]   ;;  %s1903_s5 = inlined_call_operand.hbm [shape: bf16[3,256,128], index: 5, kind: input, shape index: {}]   ;;  %s1904_s6 = inlined_call_operand.vmem [shape: bf16[48,128], index: 6, kind: input, shape index: {}]   ;;  %s1905_s7 = inlined_call_operand.hbm [shape: f32[16,128], index: 7, kind: output, shape index: {}]  }
   0x1   :  { %13 = vsyncpa [#allocation6], 0 }
   0x2   :  { %14 = vsyncpa [#allocation4], 0  ;;  %s1707_s24 = smov [#allocation2]   ;;  %s1635_s28 = scalar_lea.hbm %s1902_s4, 3072 }
   0x3   :  { %s28_s25 = sshll.u32 %s1707_s24, 4  ;;  %p1636_p0 = scmp.ne.s32.totalorder %s1902_s4, %s1635_s28  ;;  %s29_s25 = int_to_ptr.vmem [resolvable:$true] %s28_s25 }
   0x4   :  { %p1639_p1 = scmp.lt.u32.totalorder %s1635_s28, %s1902_s4 }
   0x6   :  { %p1641_p2 = pnand %p1639_p1, %p1636_p0 }
   0x8   :  { %1644 = shalt.err (!%p1641_p2)
}
   0x9   :  { %s1645_s10 = scalar_lea.vmem %s29_s25, 3072  ;;  %p1650_p4 = scmp.lt.s32.totalorder %s29_s25, %s29_s25 }
   0xa   :  { %p1646_p3 = scmp.ne.s32.totalorder %s29_s25, %s1645_s10  ;;  %p1651_p5 = scmp.lt.s32.totalorder %s1645_s10, %s1645_s10 }
   0xc   :  { %p1652_p6 = por %p1651_p5, %p1650_p4 }
   0xe   :  { %p1653_p7 = pnand %p1652_p6, %p1646_p3 }
  0x10   :  { %1656 = shalt.err (!%p1653_p7)
}
  0x11   :  { %s1708_s11 = smov 128   ;;  %s1709_s12 = smov 8  }
  0x12   :  { %34 = dma.hbm_to_vmem [thread:$0]  %s1902_s4, 3072, %s29_s25, [#allocation3], %s1708_s11, %s1708_s11, %s1709_s12  }
  0x13   :  { %s1710_s15 = smov [#allocation5]   ;;  %s1657_s19 = scalar_lea.hbm %s1903_s5, 6144 }
  0x14   :  { %s40_s16 = sshll.u32 %s1710_s15, 4  ;;  %p1658_p8 = scmp.ne.s32.totalorder %s1903_s5, %s1657_s19  ;;  %s41_s16 = int_to_ptr.vmem [resolvable:$true] %s40_s16 }
  0x15   :  { %p1661_p9 = scmp.lt.u32.totalorder %s1657_s19, %s1903_s5 }
  0x17   :  { %p1663_p10 = pnand %p1661_p9, %p1658_p8 }
  0x19   :  { %1666 = shalt.err (!%p1663_p10)
}
  0x1a   :  { %s1667_s24 = scalar_lea.vmem %s41_s16, 6144  ;;  %p1672_p12 = scmp.lt.s32.totalorder %s41_s16, %s41_s16 }
  0x1b   :  { %p1668_p11 = scmp.ne.s32.totalorder %s41_s16, %s1667_s24  ;;  %p1673_p13 = scmp.lt.s32.totalorder %s1667_s24, %s1667_s24 }
  0x1d   :  { %p1674_p0 = por %p1673_p13, %p1672_p12 }
  0x1f   :  { %p1675_p1 = pnand %p1674_p0, %p1668_p11 }
  0x21   :  { %1678 = shalt.err (!%p1675_p1)
}
  0x22   :  { %s1711_s4 = smov 64   ;;  %s1712_s25 = smov 4  }
  0x23   :  { %46 = dma.hbm_to_vmem [thread:$0]  %s1903_s5, 6144, %s41_s16, [#allocation6], %s1711_s4, %s1711_s4, %s1712_s25  }
  0x24   :  { %1701 = dma.done.wait [#allocation3], 3072  }
  0x25   :  { %1702 = vsyncadd [#allocation3], 4294964224 }
  0x26   :  { %1703 = dma.done.wait [#allocation6], 6144  }
  0x27   :  { %1704 = vsyncadd [#allocation6], 4294961152  ;;  %v1713_v0 = vmov 0.0   ;;  %vm1714_vm0 = vmmov 0   ;;  %v1525_v1 = vld [vmem:[%s1899_s1] sm:$0xff]   ;;  %v1526_v2 = vld [vmem:[%s1899_s1 + $0x8] sm:$0xff]   ;;  %v75_v13 = vlaneseq }
  0x28   :  { %1465 = vmatprep.subr.bf16.mxu0 %v1713_v0  ;;  %1481 = vmatprep.mubr.msk.bf16.mxu0 %vm1714_vm0, %v1713_v0  ;;  %v1527_v3 = vld [vmem:[%s1899_s1 + $0x10] sm:$0xff]   ;;  %v1534_v4 = vld [vmem:[%s1900_s2] sm:$0xff]   ;;  %v1528_v5 = vld [vmem:[%s1899_s1 + $0x18] sm:$0xff]   ;;  %vm205_vm1 = vcmask 392192   ;;  %v1715_v43 = vmov 0  }
  0x29   :  { %1485 = vmatprep.subr.bf16.mxu1 %v1713_v0  ;;  %1491 = vmatprep.mubr.msk.bf16.mxu1 %vm1714_vm0, %v1713_v0  ;;  %v1529_v6 = vld [vmem:[%s1899_s1 + $0x20] sm:$0xff]   ;;  %v1530_v7 = vld [vmem:[%s1899_s1 + $0x28] sm:$0xff]   ;;  %v1531_v8 = vld [vmem:[%s1899_s1 + $0x30] sm:$0xff]   ;;  %v1836_v14 = vshrl.u32 %v75_v13, 7 }
  0x2a   :  { %1466 = vmatpush3.bf16.msra.mxu0 %v1525_v1  ;;  %1486 = vmatpush3.bf16.msra.mxu1 %v1534_v4  ;;  %v1532_v9 = vld [vmem:[%s1899_s1 + $0x38] sm:$0xff]   ;;  %v1533_v10 = vld [vmem:[%s1898_s0] sm:$0xff]   ;;  %v1535_v11 = vld [vmem:[%s1900_s2 + $0x8] sm:$0xff]  }
  0x2b   :  { %1467 = vmatprep.subr.bf16.mxu0 %v1713_v0  ;;  %1487 = vmatprep.subr.bf16.mxu1 %v1713_v0  ;;  %v1536_v12 = vld [vmem:[%s1900_s2 + $0x10] sm:$0xff]   ;;  %v77_v15 = vsub.s32 0, %v1836_v14  ;;  %v1842_v16 = vld [vmem:[%s1901_s3] sm:$0x7]  ;;  %v1537_v26 = vld [vmem:[%s1900_s2 + $0x18] sm:$0xff]   ;;  %v185_v45 = vsub.s32 1, %v1836_v14 }
  0x2c   :  { %v1538_v28 = vld [vmem:[%s1900_s2 + $0x20] sm:$0xff]   ;;  %v1539_v29 = vld [vmem:[%s1900_s2 + $0x28] sm:$0xff]   ;;  %v1545_v31 = vld [vmem:[#allocation2 + $0x34] ss:$8 sps:$4 sm:$0xff]  }
  0x2d   :  { %v78_v17 = vrot.slane %v1842_v16, %v77_v15  ;;  %v1542_v30 = vld [vmem:[#allocation2 + $0x4] ss:$8 sps:$4 sm:$0xff]   ;;  %v1540_v32 = vld [vmem:[#allocation2] ss:$8 sps:$4 sm:$0xff]   ;;  %v1543_v33 = vld [vmem:[#allocation2 + $0x30] ss:$8 sps:$4 sm:$0xff]   ;;  %v186_v46 = vrot.slane %v1842_v16, %v185_v45 }
  0x2e   :  { %1468 = vmatpush3.bf16.msra.mxu0 %v1526_v2  ;;  %1488 = vmatpush3.bf16.msra.mxu1 %v1535_v11  ;;  %v1548_v34 = vld [vmem:[#allocation2 + $0x14] ss:$8 sps:$4 sm:$0xff]   ;;  %v1551_v35 = vld [vmem:[#allocation2 + $0x44] ss:$8 sps:$4 sm:$0xff]   ;;  %v1546_v36 = vld [vmem:[#allocation2 + $0x10] ss:$8 sps:$4 sm:$0xff]  }
  0x2f   :  { %1469 = vmatprep.subr.bf16.mxu0 %v1713_v0  ;;  %1489 = vmatprep.subr.bf16.mxu1 %v1713_v0  ;;  %v1549_v37 = vld [vmem:[#allocation2 + $0x40] ss:$8 sps:$4 sm:$0xff]   ;;  %v1554_v38 = vld [vmem:[#allocation2 + $0x24] ss:$8 sps:$4 sm:$0xff]   ;;  %v1557_v39 = vld [vmem:[#allocation2 + $0x54] ss:$8 sps:$4 sm:$0xff]  }
  0x30   :  { %v1552_v40 = vld [vmem:[#allocation2 + $0x20] ss:$8 sps:$4 sm:$0xff]   ;;  %v1555_v41 = vld [vmem:[#allocation2 + $0x50] ss:$8 sps:$4 sm:$0xff]   ;;  %v1560_v42 = vld [vmem:[#allocation2 + $0x64] ss:$8 sps:$4 sm:$0xff]  }
  0x31   :  { %v1563_v44 = vld [vmem:[#allocation2 + $0x94] ss:$8 sps:$4 sm:$0xff]   ;;  %v1564_v11 = vld [vmem:[#allocation2 + $0x70] ss:$8 sps:$4 sm:$0xff]   ;;  %v1572_v13 = vld [vmem:[#allocation2 + $0x84] ss:$8 sps:$4 sm:$0xff]  }
  0x32   :  { %1470 = vmatpush3.bf16.msra.mxu0 %v1527_v3  ;;  %1490 = vmatpush3.bf16.msra.mxu1 %v1536_v12  ;;  %v1567_v12 = vld [vmem:[#allocation2 + $0xa0] ss:$8 sps:$4 sm:$0xff]   ;;  %v1575_v15 = vld [vmem:[#allocation2 + $0xb4] ss:$8 sps:$4 sm:$0xff]  }
  0x33   :  { %1471 = vmatprep.subr.bf16.mxu0 %v1713_v0  ;;  %1495 = vmatprep.subr.bf16.mxu1 %v1713_v0  ;;  %v1603_v45 = vld [vmem:[#allocation5 + $0x70] sm:$0xff]  }
  0x36   :  { %1472 = vmatpush3.bf16.msra.mxu0 %v1528_v5 }
  0x37   :  { %1473 = vmatprep.subr.bf16.mxu0 %v1713_v0 }
  0x3a   :  { %1474 = vmatpush3.bf16.msra.mxu0 %v1529_v6  ;;  %v1558_v6 = vld [vmem:[#allocation2 + $0x60] ss:$8 sps:$4 sm:$0xff]  }
  0x3b   :  { %1475 = vmatprep.subr.bf16.mxu0 %v1713_v0 }
  0x3e   :  { %1476 = vmatpush3.bf16.msra.mxu0 %v1530_v7  ;;  %v1561_v7 = vld [vmem:[#allocation2 + $0x90] ss:$8 sps:$4 sm:$0xff]  }
  0x3f   :  { %1477 = vmatprep.subr.bf16.mxu0 %v1713_v0 }
  0x42   :  { %1478 = vmatpush3.bf16.msra.mxu0 %v1531_v8 }
  0x43   :  { %1479 = vmatprep.subr.bf16.mxu0 %v1713_v0 }
  0x46   :  { %1480 = vmatpush3.bf16.msra.mxu0 %v1532_v9  ;;  %v1566_v9 = vld [vmem:[#allocation2 + $0x74] ss:$8 sps:$4 sm:$0xff]  }
  0x47   :  { %448 = vmatprep.subr.bf16.mxu0 %v1545_v31  ;;  %v1585_v31 = vld [vmem:[#allocation5 + $0xc8] sm:$0xff]  }
  0x49   :  { %1482 = vmatmul.mubr.bf16.vlgmr.msra.gmra.mrb[0].mxu0 %v1533_v10  ;;  %v1569_v10 = vld [vmem:[#allocation2 + $0xa4] ss:$8 sps:$4 sm:$0xff]  }
  0x4a   :  { %449 = vmatpush1.bf16.msra.mxu0 %v1543_v33  ;;  %480 = vmatprep.mubr.bf16.mxu0 %v1715_v43  ;;  %v1589_v33 = vld [vmem:[#allocation5 + $0xd0] sm:$0xff]  }
  0x4b   :  { %450 = vmatprep.subr.bf16.mxu0 %v1551_v35  ;;  %v1593_v35 = vld [vmem:[#allocation5 + $0xd8] sm:$0xff]  }
  0x4e   :  { %451 = vmatpush1.bf16.msra.mxu0 %v1549_v37  ;;  %v1595_v37 = vld [vmem:[#allocation5 + $0x60] sm:$0xff]  }
  0x4f   :  { %452 = vmatprep.subr.bf16.mxu0 %v1557_v39  ;;  %v1597_v39 = vld [vmem:[#allocation5 + $0xe0] sm:$0xff]  }
  0x52   :  { %453 = vmatpush1.bf16.msra.mxu0 %v1555_v41  ;;  %v1599_v41 = vld [vmem:[#allocation5 + $0x68] sm:$0xff]  }
  0x53   :  { %608 = vmatprep.subr.bf16.mxu0 %v1563_v44  ;;  %v1602_v44 = vld [vmem:[#allocation5 + $0xa8] sm:$0xff]  }
 0x11c   :  { %v167_v18 = vpop.f32.mrb[0].mxu0 }
 0x11d   :  { %v168_v19 = vadd.f32 %v167_v18, %v78_v17  ;;  %v1483_v20 = vpop.f32.mrb[1].mxu0  ;;  %v1573_v18 = vld [vmem:[#allocation2 + $0xb0] ss:$8 sps:$4 sm:$0xff]  }
 0x11e   :  { %v170_v21 = vpop.f32.mrb[2].mxu0  ;;  %v1576_v20 = vld [vmem:[%s1904_s6] sm:$0xff]  }
 0x11f   :  { %v171_v22 = vadd.f32 %v170_v21, %v78_v17  ;;  %v1484_v23 = vpop.f32.mrb[3].mxu0  ;;  %v174_v24 = vmax.f32 %v168_v19, 0.0  ;;  %v1570_v17 = vld [vmem:[#allocation2 + $0x80] ss:$8 sps:$4 sm:$0xff]  }
 0x120   :  { %v1579_v19 = vld [vmem:[#allocation5 + $0x40] sm:$0xff]   ;;  %v1577_v23 = vld [vmem:[%s1904_s6 + $0x8] sm:$0xff]  }
 0x121   :  { %v175_v25 = vmax.f32 %v171_v22, 0.0  ;;  %v1580_v21 = vld [vmem:[#allocation5] sm:$0xff]   ;;  %v1583_v22 = vld [vmem:[#allocation5 + $0x48] sm:$0xff]  }
 0x123   :  { %v176_v27 = vpack.c.bf16 %v175_v25, %v174_v24  ;;  %v1584_v24 = vld [vmem:[#allocation5 + $0x8] sm:$0xff]   ;;  %v1587_v25 = vld [vmem:[#allocation5 + $0x50] sm:$0xff]  }
 0x125   :  { %1492 = vmatmul.mubr.msk.bf16.vlgmr.msra.gmra.mrb[0].mxu1 %vm205_vm1, %v176_v27 }
 0x126   :  { %1496 = vmatpush3.bf16.msra.mxu1 %v1537_v26  ;;  %1501 = vmatprep.mubr.msk.bf16.mxu1 %vm1714_vm0, %v1713_v0  ;;  %v1578_v26 = vld [vmem:[%s1904_s6 + $0x10] sm:$0xff]   ;;  %s1716_s6 = smov [#allocation7]  }
 0x127   :  { %1497 = vmatprep.subr.bf16.mxu1 %v1713_v0  ;;  %s1262_s17 = sshll.u32 %s1716_s6, 4  ;;  %s1263_s17 = int_to_ptr.vmem [resolvable:$true] %s1262_s17 }
 0x128   :  { %s1679_s18 = scalar_lea.vmem %s1263_s17, 256  ;;  %p1684_p3 = scmp.lt.s32.totalorder %s1263_s17, %s1263_s17 }
 0x129   :  { %p1680_p2 = scmp.ne.s32.totalorder %s1263_s17, %s1679_s18  ;;  %p1685_p4 = scmp.lt.s32.totalorder %s1679_s18, %s1679_s18 }
 0x12a   :  { %1498 = vmatpush3.bf16.msra.mxu1 %v1538_v28  ;;  %v1588_v28 = vld [vmem:[#allocation5 + $0x10] sm:$0xff]  }
 0x12b   :  { %1499 = vmatprep.subr.bf16.mxu1 %v1713_v0  ;;  %p1686_p5 = por %p1685_p4, %p1684_p3 }
 0x12d   :  { %p1687_p6 = pnand %p1686_p5, %p1680_p2 }
 0x12e   :  { %1500 = vmatpush3.bf16.msra.mxu1 %v1539_v29  ;;  %v1591_v29 = vld [vmem:[#allocation5 + $0x58] sm:$0xff]  }
 0x12f   :  { %368 = vmatprep.subr.bf16.mxu1 %v1542_v30  ;;  %v1582_v30 = vld [vmem:[#allocation5 + $0x80] sm:$0xff]  }
 0x131   :  { %1502 = vmatmul.mubr.msk.bf16.vlgmr.msra.gmra.mrb[4].mxu1 %vm205_vm1, %v176_v27  ;;  %v1581_v27 = vld [vmem:[#allocation5 + $0xc0] sm:$0xff]  }
 0x132   :  { %369 = vmatpush1.bf16.msra.mxu1 %v1540_v32  ;;  %400 = vmatprep.mubr.bf16.mxu1 %v1715_v43  ;;  %v1586_v32 = vld [vmem:[#allocation5 + $0x88] sm:$0xff]  }
 0x133   :  { %370 = vmatprep.subr.bf16.mxu1 %v1548_v34  ;;  %v1590_v34 = vld [vmem:[#allocation5 + $0x90] sm:$0xff]  }
 0x136   :  { %371 = vmatpush1.bf16.msra.mxu1 %v1546_v36  ;;  %v1594_v36 = vld [vmem:[#allocation5 + $0x98] sm:$0xff]  }
 0x137   :  { %372 = vmatprep.subr.bf16.mxu1 %v1554_v38  ;;  %v1596_v38 = vld [vmem:[#allocation5 + $0x20] sm:$0xff]  }
 0x13a   :  { %373 = vmatpush1.bf16.msra.mxu1 %v1552_v40  ;;  %v1598_v40 = vld [vmem:[#allocation5 + $0xa0] sm:$0xff]  }
 0x13b   :  { %528 = vmatprep.subr.bf16.mxu1 %v1560_v42  ;;  %v1601_v42 = vld [vmem:[#allocation5 + $0xe8] sm:$0xff]  }
 0x1f8   :  { %v243_v47 = vpop.f32.mrb[0].mxu1 }
 0x1f9   :  { %v244_v48 = vadd.f32 %v243_v47, %v186_v46  ;;  %v1493_v49 = vpop.f32.mrb[1].mxu1  ;;  %v1605_v47 = vld [vmem:[#allocation5 + $0xf0] sm:$0xff]  }
 0x1fa   :  { %v246_v50 = vpop.f32.mrb[2].mxu1  ;;  %v1607_v49 = vld [vmem:[#allocation5 + $0x78] sm:$0xff]  }
 0x1fb   :  { %v250_v51 = vsub.f32 0.0, %v244_v48  ;;  %v247_v52 = vadd.f32 %v246_v50, %v186_v46  ;;  %v1494_v53 = vpop.f32.mrb[3].mxu1  ;;  %v1604_v46 = vld [vmem:[#allocation5 + $0x30] sm:$0xff]   ;;  %v1608_v50 = vld [vmem:[#allocation5 + $0x38] sm:$0xff]  }
 0x1fc   :  { %v1606_v48 = vld [vmem:[#allocation5 + $0xb0] sm:$0xff]   ;;  %v1611_v53 = vld [vmem:[#allocation5 + $0x140] sm:$0xff]  }
 0x1fd   :  { %v252_v54 = vmul.f32 1.442695, %v250_v51  ;;  %v251_v55 = vsub.f32 0.0, %v247_v52  ;;  %v1609_v51 = vld [vmem:[#allocation5 + $0xf8] sm:$0xff]  }
 0x1fe   :  { %v1610_v52 = vld [vmem:[#allocation5 + $0xb8] sm:$0xff]  }
 0x1ff   :  { %1627 = vpow2.f32 %v252_v54  ;;  %v254_v56 = vmul.f32 1.442695, %v251_v55 }
 0x201   :  { %1629 = vpow2.f32 %v254_v56 }
 0x204   :  { %v319_v57 = vpop.f32.mrb[4].mxu1 }
 0x205   :  { %v1503_v58 = vpop.f32.mrb[5].mxu1 }
 0x206   :  { %v322_v59 = vpop.f32.mrb[6].mxu1 }
 0x207   :  { %v1504_v60 = vpop.f32.mrb[7].mxu1 }
 0x209   :  { %v1628_v61 = vpop.eup %1627 }
 0x20a   :  { %v256_v62 = vadd.f32 1.0, %v1628_v61 }
 0x20b   :  { %v1630_v63 = vpop.eup %1629 }
 0x20c   :  { %1631 = vrcp.f32 %v256_v62  ;;  %v257_v1 = vadd.f32 1.0, %v1630_v63 }
 0x20e   :  { %1633 = vrcp.f32 %v257_v1 }
 0x216   :  { %v1632_v2 = vpop.eup %1631 }
 0x217   :  { %v326_v3 = vmul.f32 %v1632_v2, %v319_v57 }
 0x218   :  { %v1634_v4 = vpop.eup %1633 }
 0x219   :  { %v327_v5 = vmul.f32 %v1634_v4, %v322_v59 }
 0x21b   :  { %v328_v8 = vpack.c.bf16 %v327_v5, %v326_v3 }
 0x21d   :  { %1304 = vmatmul.mubr.msk.bf16.vlgmr.msra.gmra.mrb[8].mxu1 %vm205_vm1, %v328_v8  ;;  %1311 = vmatmul.mubr.msk.bf16.vlgmr.msra.gmra.mrb[4].mxu0 %vm205_vm1, %v328_v8 }
 0x21e   :  { %529 = vmatpush1.bf16.msra.mxu1 %v1558_v6  ;;  %609 = vmatpush1.bf16.msra.mxu0 %v1561_v7 }
 0x21f   :  { %530 = vmatprep.subr.bf16.mxu1 %v1566_v9  ;;  %610 = vmatprep.subr.bf16.mxu0 %v1569_v10 }
 0x220   :  { %560 = vmatprep.mubr.bf16.mxu1 %v1715_v43  ;;  %640 = vmatprep.mubr.bf16.mxu0 %v1715_v43  ;;  %v1600_v43 = vld [vmem:[#allocation5 + $0x28] sm:$0xff]  }
 0x222   :  { %531 = vmatpush1.bf16.msra.mxu1 %v1564_v11  ;;  %611 = vmatpush1.bf16.msra.mxu0 %v1567_v12 }
 0x223   :  { %532 = vmatprep.subr.bf16.mxu1 %v1572_v13  ;;  %612 = vmatprep.subr.bf16.mxu0 %v1575_v15 }
 0x226   :  { %533 = vmatpush1.bf16.msra.mxu1 %v1570_v17  ;;  %613 = vmatpush1.bf16.msra.mxu0 %v1573_v18 }
 0x227   :  { %1505 = vmatprep.subr.bf16.mxu0 %v1713_v0  ;;  %1395 = vmatprep.subr.bf16.mxu1 %v1579_v19 }
 0x229   :  { %1318 = vmatmul.mubr.msk.bf16.vlgmr.msra.gmra.mrb[12].mxu1 %vm205_vm1, %v328_v8  ;;  %1325 = vmatmul.mubr.msk.bf16.vlgmr.msra.gmra.mrb[8].mxu0 %vm205_vm1, %v328_v8 }
 0x22a   :  { %1506 = vmatpush3.bf16.msra.mxu0 %v1576_v20  ;;  %1511 = vmatprep.mubr.msk.bf16.mxu0 %vm1714_vm0, %v1713_v0 }
 0x22b   :  { %1507 = vmatprep.subr.bf16.mxu0 %v1713_v0  ;;  %1396 = vmatpush3.bf16.msra.mxu1 %v1580_v21 }
 0x22c   :  { %1397 = vmatprep.subr.bf16.mxu1 %v1583_v22 }
 0x22e   :  { %1508 = vmatpush3.bf16.msra.mxu0 %v1577_v23 }
 0x22f   :  { %1509 = vmatprep.subr.bf16.mxu0 %v1713_v0  ;;  %1398 = vmatpush3.bf16.msra.mxu1 %v1584_v24  ;;  %v1592_v0 = vld [vmem:[#allocation5 + $0x18] sm:$0xff]  }
 0x230   :  { %1399 = vmatprep.subr.bf16.mxu1 %v1587_v25 }
 0x232   :  { %1510 = vmatpush3.bf16.msra.mxu0 %v1578_v26 }
 0x233   :  { %1421 = vmatprep.subr.bf16.mxu0 %v1581_v27  ;;  %1400 = vmatpush3.bf16.msra.mxu1 %v1588_v28  ;;  %v1612_v27 = vld [vmem:[#allocation5 + $0x100] sm:$0xff]   ;;  %v1613_v28 = vld [vmem:[#allocation5 + $0x148] sm:$0xff]  }
 0x234   :  { %1401 = vmatprep.subr.bf16.mxu1 %v1591_v29  ;;  %v1614_v29 = vld [vmem:[#allocation5 + $0x108] sm:$0xff]  }
 0x235   :  { %1512 = vmatmul.mubr.msk.bf16.vlgmr.msra.gmra.mrb[12].mxu0 %vm205_vm1, %v328_v8 }
 0x236   :  { %1422 = vmatpush3.bf16.msra.mxu0 %v1582_v30  ;;  %v1615_v30 = vld [vmem:[#allocation5 + $0x150] sm:$0xff]  }
 0x237   :  { %1423 = vmatprep.subr.bf16.mxu0 %v1585_v31  ;;  %1402 = vmatpush3.bf16.msra.mxu1 %v1592_v0 }
 0x238   :  { %1403 = vmatprep.subr.bf16.mxu1 %v1595_v37  ;;  %v1619_v37 = vld [vmem:[#allocation5 + $0x160] sm:$0xff]  }
 0x23a   :  { %1424 = vmatpush3.bf16.msra.mxu0 %v1586_v32 }
 0x23b   :  { %1425 = vmatprep.subr.bf16.mxu0 %v1589_v33  ;;  %1404 = vmatpush3.bf16.msra.mxu1 %v1596_v38  ;;  %v1620_v38 = vld [vmem:[#allocation5 + $0x120] sm:$0xff]  }
 0x23c   :  { %1405 = vmatprep.subr.bf16.mxu1 %v1599_v41  ;;  %v1623_v41 = vld [vmem:[#allocation5 + $0x170] sm:$0xff]  }
 0x23e   :  { %1426 = vmatpush3.bf16.msra.mxu0 %v1590_v34  ;;  %v1616_v34 = vld [vmem:[#allocation5 + $0x110] sm:$0xff]  }
 0x23f   :  { %1427 = vmatprep.subr.bf16.mxu0 %v1593_v35  ;;  %1406 = vmatpush3.bf16.msra.mxu1 %v1600_v43  ;;  %v1617_v35 = vld [vmem:[#allocation5 + $0x158] sm:$0xff]  }
 0x240   :  { %1407 = vmatprep.subr.bf16.mxu1 %v1603_v45  ;;  %v1625_v43 = vld [vmem:[#allocation5 + $0x178] sm:$0xff]  }
 0x242   :  { %1428 = vmatpush3.bf16.msra.mxu0 %v1594_v36  ;;  %v1618_v36 = vld [vmem:[#allocation5 + $0x118] sm:$0xff]  }
 0x243   :  { %1429 = vmatprep.subr.bf16.mxu0 %v1597_v39  ;;  %1408 = vmatpush3.bf16.msra.mxu1 %v1604_v46  ;;  %v1621_v39 = vld [vmem:[#allocation5 + $0x168] sm:$0xff]  }
 0x244   :  { %1409 = vmatprep.subr.bf16.mxu1 %v1607_v49 }
 0x246   :  { %1430 = vmatpush3.bf16.msra.mxu0 %v1598_v40  ;;  %v1622_v40 = vld [vmem:[#allocation5 + $0x128] sm:$0xff]  }
 0x247   :  { %1431 = vmatprep.subr.bf16.mxu0 %v1601_v42  ;;  %1410 = vmatpush3.bf16.msra.mxu1 %v1608_v50  ;;  %v1624_v42 = vld [vmem:[#allocation5 + $0x130] sm:$0xff]  }
 0x248   :  { %1443 = vmatprep.subr.bf16.mxu1 %v1611_v53 }
 0x24a   :  { %1432 = vmatpush3.bf16.msra.mxu0 %v1602_v44  ;;  %v1626_v44 = vld [vmem:[#allocation5 + $0x138] sm:$0xff]  }
 0x24b   :  { %1433 = vmatprep.subr.bf16.mxu0 %v1605_v47 }
 0x24e   :  { %1434 = vmatpush3.bf16.msra.mxu0 %v1606_v48 }
 0x24f   :  { %1435 = vmatprep.subr.bf16.mxu0 %v1609_v51 }
 0x252   :  { %1436 = vmatpush3.bf16.msra.mxu0 %v1610_v52 }
 0x2f0   :  { %v402_v54 = vpop.f32.mrb[8].mxu1  ;;  %v482_v55 = vpop.f32.mrb[4].mxu0 }
 0x2f1   :  { %v404_v56 = vpop.f32.mrb[9].mxu1  ;;  %v484_v57 = vpop.f32.mrb[5].mxu0 }
 0x2f2   :  { %v406_v58 = vpop.f32.mrb[10].mxu1  ;;  %v486_v59 = vpop.f32.mrb[6].mxu0 }
 0x2f3   :  { %v408_v60 = vpop.f32.mrb[11].mxu1  ;;  %v488_v61 = vpop.f32.mrb[7].mxu0 }
 0x2fc   :  { %v562_v62 = vpop.f32.mrb[12].mxu1  ;;  %v642_v63 = vpop.f32.mrb[8].mxu0 }
 0x2fd   :  { %v651_v1 = vmul.f32 %v562_v62, %v402_v54  ;;  %v657_v2 = vmul.f32 %v642_v63, %v402_v54  ;;  %v663_v3 = vmul.f32 %v642_v63, %v482_v55  ;;  %v564_v4 = vpop.f32.mrb[13].mxu1  ;;  %v644_v5 = vpop.f32.mrb[9].mxu0 }
 0x2fe   :  { %v652_v6 = vmul.f32 %v564_v4, %v404_v56  ;;  %v658_v7 = vmul.f32 %v644_v5, %v404_v56  ;;  %v664_v8 = vmul.f32 %v644_v5, %v484_v57  ;;  %v566_v9 = vpop.f32.mrb[14].mxu1  ;;  %v646_v10 = vpop.f32.mrb[10].mxu0 }
 0x2ff   :  { %v653_v11 = vmul.f32 %v566_v9, %v406_v58  ;;  %v659_v12 = vmul.f32 %v646_v10, %v406_v58  ;;  %v665_v13 = vmul.f32 %v646_v10, %v486_v59  ;;  %v568_v15 = vpop.f32.mrb[15].mxu1  ;;  %v648_v17 = vpop.f32.mrb[11].mxu0 }
 0x300   :  { %v654_v18 = vmul.f32 %v568_v15, %v408_v60  ;;  %v660_v19 = vmul.f32 %v648_v17, %v408_v60  ;;  %v666_v20 = vmul.f32 %v648_v17, %v488_v61  ;;  %v1249_v61 = vsub.s32 2, %v1836_v14 }
 0x301   :  { %v655_v21 = vpack.c.bf16 %v653_v11, %v651_v1  ;;  %v661_v22 = vpack.c.bf16 %v659_v12, %v657_v2  ;;  %v667_v23 = vpack.c.bf16 %v665_v13, %v663_v3 }
 0x302   :  { %v656_v24 = vpack.c.bf16 %v654_v18, %v652_v6  ;;  %v662_v25 = vpack.c.bf16 %v660_v19, %v658_v7  ;;  %v668_v26 = vpack.c.bf16 %v666_v20, %v664_v8  ;;  %v1250_v2 = vrot.slane %v1842_v16, %v1249_v61 }
 0x304   :  { %835 = vmatprep.mubr.bf16.mxu1 %v656_v24  ;;  %1064 = vmatprep.mubr.bf16.mxu0 %v662_v25 }
 0x305   :  { %836 = vmatmul.mubr.bf16.vlgmr.msra.gmra.mrb[16].mxu1 %v655_v21  ;;  %1065 = vmatmul.mubr.bf16.vlgmr.msra.gmra.mrb[16].mxu0 %v661_v22 }
 0x306   :  { %1444 = vmatpush3.bf16.msra.mxu1 %v1612_v27  ;;  %1236 = vmatprep.mubr.bf16.mxu1 %v668_v26 }
 0x307   :  { %1445 = vmatprep.subr.bf16.mxu1 %v1613_v28 }
 0x308   :  { %v896_v31 = vpop.f32.mrb[12].mxu0 }
 0x309   :  { %v1513_v32 = vpop.f32.mrb[13].mxu0 }
 0x30a   :  { %1446 = vmatpush3.bf16.msra.mxu1 %v1614_v29  ;;  %v899_v33 = vpop.f32.mrb[14].mxu0 }
 0x30b   :  { %v1514_v0 = vpop.f32.mrb[15].mxu0  ;;  %1447 = vmatprep.subr.bf16.mxu1 %v1615_v30 }
 0x30e   :  { %1448 = vmatpush3.bf16.msra.mxu1 %v1616_v34 }
 0x30f   :  { %1449 = vmatprep.subr.bf16.mxu1 %v1617_v35 }
 0x312   :  { %1450 = vmatpush3.bf16.msra.mxu1 %v1618_v36 }
 0x313   :  { %1451 = vmatprep.subr.bf16.mxu1 %v1619_v37 }
 0x316   :  { %1452 = vmatpush3.bf16.msra.mxu1 %v1620_v38 }
 0x317   :  { %1453 = vmatprep.subr.bf16.mxu1 %v1621_v39 }
 0x31a   :  { %1454 = vmatpush3.bf16.msra.mxu1 %v1622_v40 }
 0x31b   :  { %1455 = vmatprep.subr.bf16.mxu1 %v1623_v41 }
 0x31e   :  { %1456 = vmatpush3.bf16.msra.mxu1 %v1624_v42 }
 0x31f   :  { %1457 = vmatprep.subr.bf16.mxu1 %v1625_v43 }
 0x322   :  { %1458 = vmatpush3.bf16.msra.mxu1 %v1626_v44 }
 0x325   :  { %1237 = vmatmul.mubr.bf16.vlgmr.msra.gmra.mrb[20].mxu1 %v667_v23 }
 0x3d8   :  { %v1411_v45 = vpop.f32.mrb[16].mxu1  ;;  %v1437_v46 = vpop.f32.mrb[16].mxu0 }
 0x3d9   :  { %v1412_v47 = vpop.f32.mrb[17].mxu1  ;;  %v1438_v48 = vpop.f32.mrb[17].mxu0 }
 0x3da   :  { %v1413_v49 = vadd.f32 %v1412_v47, %v1411_v45  ;;  %v1439_v50 = vadd.f32 %v1438_v48, %v1437_v46  ;;  %v1414_v51 = vpop.f32.mrb[18].mxu1  ;;  %v1440_v52 = vpop.f32.mrb[18].mxu0 }
 0x3db   :  { %v1415_v53 = vpop.f32.mrb[19].mxu1  ;;  %v1441_v54 = vpop.f32.mrb[19].mxu0 }
 0x3dc   :  { %v897_v55 = vadd.f32 %v1413_v49, %v896_v31  ;;  %v1416_v56 = vadd.f32 %v1415_v53, %v1414_v51  ;;  %v1442_v57 = vadd.f32 %v1441_v54, %v1440_v52 }
 0x3de   :  { %v1073_v58 = vadd.f32 %v1439_v50, %v897_v55  ;;  %v900_v59 = vadd.f32 %v1416_v56, %v899_v33 }
 0x3e0   :  { %v1074_v60 = vadd.f32 %v1442_v57, %v900_v59 }
 0x3f8   :  { %v1459_v62 = vpop.f32.mrb[20].mxu1 }
 0x3f9   :  { %v1460_v63 = vpop.f32.mrb[21].mxu1 }
 0x3fa   :  { %v1461_v1 = vadd.f32 %v1460_v63, %v1459_v62  ;;  %v1462_v3 = vpop.f32.mrb[22].mxu1 }
 0x3fb   :  { %v1463_v4 = vpop.f32.mrb[23].mxu1 }
 0x3fc   :  { %v1245_v5 = vadd.f32 %v1461_v1, %v1073_v58  ;;  %v1464_v6 = vadd.f32 %v1463_v4, %v1462_v3 }
 0x3fe   :  { %v1251_v7 = vadd.f32 %v1250_v2, %v1245_v5  ;;  %v1246_v8 = vadd.f32 %v1464_v6, %v1074_v60 }
 0x400   :  { %v1253_v9 = vmax.f32 %v1251_v7, 0.0  ;;  %v1252_v10 = vadd.f32 %v1250_v2, %v1246_v8 }
 0x402   :  { %1255 = vst [vmem:[#allocation7] sm:$0xff] %v1253_v9  ;;  %v1254_v11 = vmax.f32 %v1252_v10, 0.0 }
 0x404   :  { %1256 = vst [vmem:[#allocation7 + $0x8] sm:$0xff] %v1254_v11 }
 0x405   :  { %1690 = shalt.err (!%p1687_p6)
}
 0x406   :  { %s1691_s21 = scalar_lea.hbm %s1905_s7, 256 }
 0x407   :  { %p1692_p7 = scmp.ne.s32.totalorder %s1905_s7, %s1691_s21  ;;  %p1695_p8 = scmp.lt.u32.totalorder %s1691_s21, %s1905_s7 }
 0x409   :  { %p1697_p9 = pnand %p1695_p8, %p1692_p7 }
 0x40b   :  { %1700 = shalt.err (!%p1697_p9)
}
 0x40c   :  { %1268 = dma.vmem_to_hbm [thread:$0]  %s1263_s17, 256, %s1905_s7, [#allocation4], %s1708_s11, %s1708_s11, %s1709_s12  }
 0x40d   :  { %1705 = dma.done.wait [#allocation4], 256  }
 0x40e   :  { %1706 = vsyncadd [#allocation4], 4294967040 }
 0x40f   :  { %1272 = vsyncpa [#allocation3], 1 }
 0x410   :  { %1273 = vsyncpa [#allocation6], 1 }
 0x411   :  { %1274 = vsyncpa [#allocation4], 1 }

</bundles_post_ra>
